<compile_context>
chip_gen: v7x
topology: tpu7x:2x2x1
jax: 0.10.0
libtpu: 0.0.40
codegen_flags: <defaults>
</compile_context>

<pallas_src>
import functools

import jax
import jax.numpy as jnp
import numpy as np
from jax.experimental import pallas as pl
from jax.experimental.pallas import tpu as pltpu


def _channel_attention_kernel(x_ref, w1_ref, w2_ref, o_ref, *, inv_hw):
    # x_ref block: (Bt, C, HW); weights are tiny and VMEM-resident.
    x = x_ref[...]                                     # (Bt, C, HW), native dtype
    w1 = w1_ref[...].astype(jnp.float32)               # (Ch, C)  = fc1 weight
    w2 = w2_ref[...].astype(jnp.float32)               # (C, Ch)  = fc2 weight

    bt = x.shape[0]
    xf = x.astype(jnp.float32)

    # Global average / max pooling over the spatial (lane) axis, in f32.
    avg = jnp.sum(xf, axis=-1) * inv_hw                # (Bt, C)
    mx = jnp.max(xf, axis=-1)                          # (Bt, C)

    # Fuse the two MLP branches: stack pooled vectors -> one pair of MXU dots.
    p = jnp.concatenate([avg, mx], axis=0)             # (2*Bt, C)

    # h = relu(p @ w1^T)  -> (2*Bt, Ch)
    h = jax.lax.dot_general(
        p, w1, (((1,), (1,)), ((), ())), preferred_element_type=jnp.float32)
    h = jnp.maximum(h, 0.0)

    # y = h @ w2^T        -> (2*Bt, C)
    y = jax.lax.dot_general(
        h, w2, (((1,), (1,)), ((), ())), preferred_element_type=jnp.float32)

    # sigmoid(avg_branch + max_branch) -> per-(image, channel) scale.
    scale = jax.nn.sigmoid(y[:bt] + y[bt:]).astype(x.dtype)   # (Bt, C)

    # Broadcast the scale over the lane (HW) axis and stream the slab back out
    # in its native dtype (no f32 upcast of the full block on the store path).
    o_ref[...] = (x * scale[:, :, None]).astype(o_ref.dtype)


def _pick_batch_tile(B, C, HW, itemsize):
    """Largest divisor of B such that the per-step slab stays ~3 MiB and
    (when B >= 2) at least 2 grid steps remain for megacore sharding."""
    bytes_per_image = C * HW * itemsize
    max_block_bytes = 3 * 1024 * 1024           # in+out double-buffered -> <= ~12 MiB
    bt_cap = max(1, max_block_bytes // bytes_per_image)
    if B >= 2:
        bt_cap = min(bt_cap, max(1, B // 2))    # keep >= 2 grid steps (v7x: 2 TCs)
    bt_cap = max(1, min(bt_cap, B))
    for bt in range(bt_cap, 0, -1):
        if B % bt == 0:
            return bt
    return 1


@jax.jit
def channel_attention(x, w1, w2):
    """x: (B, C, H, W); w1: (C//ratio, C) fc1 weight; w2: (C, C//ratio) fc2 weight."""
    B, C, H, W = x.shape
    HW = H * W
    Ch = w1.shape[0]

    x_flat = x.reshape(B, C, HW)                 # contiguous NCHW -> free reshape
    bt = _pick_batch_tile(B, C, HW, x.dtype.itemsize)
    grid = (B // bt,)

    # VMEM budget: double-buffered input + output blocks, plus weights/temps slack.
    block_bytes = bt * C * HW * x.dtype.itemsize
    vmem_limit = min(128 * 1024 * 1024, max(32 * 1024 * 1024, 4 * block_bytes + (4 << 20)))

    kernel = functools.partial(_channel_attention_kernel, inv_hw=1.0 / HW)

    out_flat = pl.pallas_call(
        kernel,
        out_shape=jax.ShapeDtypeStruct((B, C, HW), x.dtype),
        grid_spec=pltpu.PrefetchScalarGridSpec(
            num_scalar_prefetch=0,
            grid=grid,
            in_specs=[
                pl.BlockSpec((bt, C, HW), lambda b: (b, 0, 0)),
                pl.BlockSpec((Ch, C), lambda b: (0, 0)),    # resident fc1 weight
                pl.BlockSpec((C, Ch), lambda b: (0, 0)),    # resident fc2 weight
            ],
            out_specs=pl.BlockSpec((bt, C, HW), lambda b: (b, 0, 0)),
        ),
        compiler_params=pltpu.CompilerParams(
            dimension_semantics=("parallel",),
            vmem_limit_bytes=int(vmem_limit),
        ),
    )(x_flat, w1, w2)

    return out_flat.reshape(B, C, H, W)


def channel_attention_ref(x, w1, w2):
    # Pure-JAX reference matching the PyTorch forward.
    avg = jnp.mean(x, axis=(2, 3), keepdims=True)       # (B, C, 1, 1)
    mx = jnp.max(x, axis=(2, 3), keepdims=True)         # (B, C, 1, 1)

    def mlp(p):
        h = jnp.einsum("oc,bcxy->boxy", w1, p)
        h = jnp.maximum(h, 0.0)
        return jnp.einsum("co,boxy->bcxy", w2, h)

    scale = jax.nn.sigmoid(mlp(avg) + mlp(mx))
    return x * scale


if __name__ == "__main__":
    # in_planes = 64, ratio = 16 -> hidden = 4 (matches ChannelAttention defaults)
    B, C, H, W = 2, 64, 16, 16
    ratio = 16
    Ch = C // ratio

    key = jax.random.PRNGKey(0)
    kx, k1, k2 = jax.random.split(key, 3)

    x = jax.random.normal(kx, (B, C, H, W), dtype=jnp.float32)
    # Synthetic weights: Conv2d(C, Ch, 1, bias=False).weight squeezed to (Ch, C), etc.
    w1 = jax.random.normal(k1, (Ch, C), dtype=jnp.float32) * 0.1   # fc1
    w2 = jax.random.normal(k2, (C, Ch), dtype=jnp.float32) * 0.1   # fc2

    out = channel_attention(x, w1, w2)
    out = jax.block_until_ready(out)

    ref = channel_attention_ref(x, w1, w2)
    np.testing.assert_allclose(np.asarray(out), np.asarray(ref), rtol=1e-5, atol=1e-5)

    print("KERNEL_OK")
</pallas_src>

<mosaic_0001>
module attributes {stable_mosaic.version = 11 : i64} {
  func.func @_channel_attention_kernel(%arg0: i32, %arg1: memref<1x64x256xf32, #tpu.memory_space<vmem>>, %arg2: memref<4x64xf32, #tpu.memory_space<vmem>>, %arg3: memref<64x4xf32, #tpu.memory_space<vmem>>, %arg4: memref<1x64x256xf32, #tpu.memory_space<vmem>>) attributes {dimension_semantics = [#tpu.dimension_semantics<parallel>], iteration_bounds = array<i64: 2>, scalar_prefetch = 0 : i64, scratch_operands = 0 : i64, tpu.core_type = #tpu.core_type<tc>, window_params = [{transform_indices = @transform_0, window_bounds = array<i64: 1, 64, 256>}, {pipeline_mode = #tpu.pipeline_mode<synchronous>, transform_indices = @transform_1, window_bounds = array<i64: 4, 64>}, {pipeline_mode = #tpu.pipeline_mode<synchronous>, transform_indices = @transform_2, window_bounds = array<i64: 64, 4>}, {transform_indices = @transform_3, window_bounds = array<i64: 1, 64, 256>}]} {
    %c0 = arith.constant 0 : index
    %c0_0 = arith.constant 0 : index
    %c0_1 = arith.constant 0 : index
    %0 = vector.load %arg1[%c0, %c0_0, %c0_1] : memref<1x64x256xf32, #tpu.memory_space<vmem>>, vector<1x64x256xf32>
    %c0_2 = arith.constant 0 : index
    %c0_3 = arith.constant 0 : index
    %1 = vector.load %arg2[%c0_2, %c0_3] : memref<4x64xf32, #tpu.memory_space<vmem>>, vector<4x64xf32>
    %c0_4 = arith.constant 0 : index
    %c0_5 = arith.constant 0 : index
    %2 = vector.load %arg3[%c0_4, %c0_5] : memref<64x4xf32, #tpu.memory_space<vmem>>, vector<64x4xf32>
    %cst = arith.constant dense<0.000000e+00> : vector<1x64xf32>
    %3 = vector.multi_reduction <add>, %0, %cst [2] : vector<1x64x256xf32> to vector<1x64xf32>
    %cst_6 = arith.constant 3.906250e-03 : f32
    %4 = vector.broadcast %cst_6 : f32 to vector<1x64xf32>
    %5 = arith.mulf %3, %4 : vector<1x64xf32>
    %cst_7 = arith.constant dense<0xFF800000> : vector<1x64xf32>
    %6 = vector.multi_reduction <maximumf>, %0, %cst_7 [2] : vector<1x64x256xf32> to vector<1x64xf32>
    %7 = tpu.concatenate %5, %6 in 0 : vector<1x64xf32>, vector<1x64xf32> -> vector<2x64xf32>
    %cst_8 = arith.constant dense<0.000000e+00> : vector<2x4xf32>
    %8 = tpu.matmul %7, %1, %cst_8 {dimension_numbers = #tpu.dot_dimension_numbers<[1], [1], [0], [0], [0, 0, 1, 0], [], []>} : vector<2x64xf32>, vector<4x64xf32>, vector<2x4xf32> -> vector<2x4xf32>
    %cst_9 = arith.constant 0.000000e+00 : f32
    %9 = vector.broadcast %cst_9 : f32 to vector<2x4xf32>
    %10 = arith.maximumf %8, %9 : vector<2x4xf32>
    %cst_10 = arith.constant dense<0.000000e+00> : vector<2x64xf32>
    %11 = tpu.matmul %10, %2, %cst_10 {dimension_numbers = #tpu.dot_dimension_numbers<[1], [1], [0], [0], [0, 0, 1, 0], [], []>} : vector<2x4xf32>, vector<64x4xf32>, vector<2x64xf32> -> vector<2x64xf32>
    %12 = vector.extract_strided_slice %11 {offsets = [0, 0], sizes = [1, 64], strides = [1, 1]} : vector<2x64xf32> to vector<1x64xf32>
    %13 = vector.extract_strided_slice %11 {offsets = [1, 0], sizes = [1, 64], strides = [1, 1]} : vector<2x64xf32> to vector<1x64xf32>
    %14 = arith.addf %12, %13 : vector<1x64xf32>
    %15 = arith.negf %14 : vector<1x64xf32>
    %16 = math.exp %15 : vector<1x64xf32>
    %cst_11 = arith.constant 1.000000e+00 : f32
    %17 = vector.broadcast %cst_11 : f32 to vector<1x64xf32>
    %18 = arith.addf %17, %16 : vector<1x64xf32>
    %19 = arith.divf %17, %18 : vector<1x64xf32>
    %20 = vector.shape_cast %19 : vector<1x64xf32> to vector<1x64x1xf32>
    %21 = vector.broadcast %20 : vector<1x64x1xf32> to vector<1x64x256xf32>
    %22 = arith.mulf %0, %21 : vector<1x64x256xf32>
    %c0_12 = arith.constant 0 : index
    %c0_13 = arith.constant 0 : index
    %c0_14 = arith.constant 0 : index
    %23 = vector.load %arg4[%c0_12, %c0_13, %c0_14] : memref<1x64x256xf32, #tpu.memory_space<vmem>>, vector<1x64x256xf32>
    tpu.vector_store %arg4[%c0_12, %c0_13, %c0_14], %22 {strides = array<i32>} : memref<1x64x256xf32, #tpu.memory_space<vmem>>, vector<1x64x256xf32>,
    return
  }
  func.func @transform_0(%arg0: i32) -> (i32, i32, i32) {
    %c0_i32 = arith.constant 0 : i32
    %c0_i32_0 = arith.constant 0 : i32
    %c0_i32_1 = arith.constant 0 : i32
    return %arg0, %c0_i32, %c0_i32_0 : i32, i32, i32
  }
  func.func @transform_1(%arg0: i32) -> (i32, i32) {
    %c0_i32 = arith.constant 0 : i32
    %c0_i32_0 = arith.constant 0 : i32
    %c0_i32_1 = arith.constant 0 : i32
    return %c0_i32, %c0_i32_0 : i32, i32
  }
  func.func @transform_2(%arg0: i32) -> (i32, i32) {
    %c0_i32 = arith.constant 0 : i32
    %c0_i32_0 = arith.constant 0 : i32
    %c0_i32_1 = arith.constant 0 : i32
    return %c0_i32, %c0_i32_0 : i32, i32
  }
  func.func @transform_3(%arg0: i32) -> (i32, i32, i32) {
    %c0_i32 = arith.constant 0 : i32
    %c0_i32_0 = arith.constant 0 : i32
    %c0_i32_1 = arith.constant 0 : i32
    return %arg0, %c0_i32, %c0_i32_0 : i32, i32, i32
  }
}

</mosaic_0001>

<bundles_post_ra>
// kernel: channel_attention.1
= control target key start
LH: loop header
LB: loop body
LE: loop exit
PB: predicated region body
PF: predicated region fallthrough
CT: control target
= control target key end

     0   :  { %s796_s12 = smov 0   ;;  %s999_s0 = inlined_call_operand.vmem [shape: f32[2,64,256], index: 0, kind: input, shape index: {}]   ;;  %s1000_s1 = inlined_call_operand.vmem [shape: f32[4,64], index: 1, kind: input, shape index: {}]   ;;  %s1001_s2 = inlined_call_operand.vmem [shape: f32[64,4], index: 2, kind: input, shape index: {}]   ;;  %s1002_s3 = inlined_call_operand.vmem [shape: f32[2,64,256], index: 3, kind: output, shape index: {}]  }
   0x1 LB: > { %s674_s13 = sadd.s32 4294967295, %s771_s12   ;;  %p678_p0 = scmp.ge.s32.totalorder %s771_s12, 1  ;;  %s771_s12 = sphi %s796_s12, %s13_s12  }
   0x2   : > { %p137_p1 = scmp.lt.s32.totalorder %s771_s12, 3 }
   0x4   : > { %p138_p2 = pnand %p678_p0, %p137_p1 }
   0x5   : > { %p161_p3 = scmp.lt.s32.totalorder (!%p138_p2), %s674_s13, 1  ;;  %v773_v32 = vmov (!%p138_p2), 0.0   ;;  %v187_v33 = vld [vmem:[%s1000_s1] sm:$0xf] (!%p138_p2)  ;;  %vm366_vm0 = vcmask (!%p138_p2), 523264   ;;  %vm774_vm1 = vmmov (!%p138_p2), 0   ;;  %v260_v51 = vlaneseq (!%p138_p2) }
   0x6   : > { %141 = sbr.rel (%p138_p2) target bundleno = 787 (0x313), region = 32  ;;  %710 = vmatprep.subr.mxu0 (!%p138_p2), %v773_v32  ;;  %712 = vmatprep.mubr.msk.f32.mxu0 (!%p138_p2), %vm774_vm1, %v773_v32  ;;  %v188_v34 = vld [vmem:[%s1001_s2] sm:$0xff] (!%p138_p2)  ;;  %v189_v35 = vld [vmem:[%s1001_s2 + $0x8] sm:$0xff] (!%p138_p2)  ;;  %vm444_vm2 = vcmask (!%p138_p2), 31744   ;;  %v775_v36 = vmov (!%p138_p2), 0.0|0.0   ;;  %v190_v39 = vld [vmem:[%s1001_s2 + $0x10] sm:$0xff] (!%p138_p2) }
   0x7   : > { %711 = vmatpush3.xpose.msk.msra.mxu0 (!%p138_p2), %vm366_vm0, %v187_v33  ;;  %731 = vmatprep.mubr.msk.f32.mxu1 (!%p138_p2), %vm774_vm1, %v773_v32  ;;  %v735_v37 = vpack.c.bf16 (!%p138_p2), %v189_v35, %v188_v34  ;;  %vm906_vm3 = vmpackc.low (!%p138_p2), %vm444_vm2, %vm444_vm2  ;;  %v191_v40 = vld [vmem:[%s1001_s2 + $0x18] sm:$0xff] (!%p138_p2)  ;;  %v192_v42 = vld [vmem:[%s1001_s2 + $0x20] sm:$0xff] (!%p138_p2)  ;;  %v261_v54 = vand.u32 (!%p138_p2), 127, %v260_v51  ;;  %v936_v58 = vshrl.u32 (!%p138_p2), %v260_v51, 7  ;;  %vm271_vm4 = vcmask (!%p138_p2), 130112  }
   0x8   : > { %734 = vmatprep.subr.bf16.mxu1 (!%p138_p2), %v775_v36  ;;  %v739_v41 = vpack.c.bf16 (!%p138_p2), %v191_v40, %v190_v39  ;;  %v193_v43 = vld [vmem:[%s1001_s2 + $0x28] sm:$0xff] (!%p138_p2)  ;;  %v194_v45 = vld [vmem:[%s1001_s2 + $0x30] sm:$0xff] (!%p138_p2)  ;;  %v195_v46 = vld [vmem:[%s1001_s2 + $0x38] sm:$0xff] (!%p138_p2)  ;;  %vm278_vm5 = vcmask (!%p138_p2), 195712   ;;  %vm285_vm6 = vcmask (!%p138_p2), 261312   ;;  %vm292_vm7 = vcmask (!%p138_p2), 326912  }
   0x9   : > { %737 = vmatpush3.bf16.xpose.msk.msra.mxu1 (!%p138_p2), %vm906_vm3, %v735_v37  ;;  %v743_v44 = vpack.c.bf16 (!%p138_p2), %v193_v43, %v192_v42  ;;  %v747_v47 = vpack.c.bf16 (!%p138_p2), %v195_v46, %v194_v45  ;;  %v266_v56 = vadd.s32 (!%p138_p2), 4294967288, %v261_v54  ;;  %v273_v62 = vadd.s32 (!%p138_p2), 4294967280, %v261_v54 }
   0xa   : > { %738 = vmatprep.subr.bf16.mxu1 (!%p138_p2), %v775_v36  ;;  %vm299_vm8 = vcmask (!%p138_p2), 392512   ;;  %vm306_vm9 = vcmask (!%p138_p2), 458112   ;;  %vm313_vm10 = vcmask (!%p138_p2), 523712   ;;  %vm364_vm11 = vcmask (!%p138_p2), 1040384  }
   0xb   : > { %v269_v60 = vsub.s32 (!%p138_p2), %v266_v56, %v936_v58 }
   0xd   : > { %s1006_s13 = smov (!%p161_p3, %s674_s13), 1 }
   0xe   : > { %s697_s14 = sshll.u32 %s1006_s13, 7 }
   0xf   : > { %s812_s17 = scalar_lea.vmem %s999_s0, %s697_s14  ;;  %s962_s11 = scalar_lea.vmem %s1002_s3, %s697_s14 }
  0x10   : > { %v815_v0 = vld [vmem:[%s812_s17 + $0x20] sm:$0xff]  ;;  %v818_v1 = vld [vmem:[%s812_s17 + $0x28] sm:$0xff]  ;;  %v829_v5 = vld [vmem:[%s812_s17 + $0x30] sm:$0xff] }
  0x11   : > { %v821_v2 = vld [vmem:[%s812_s17] sm:$0xff]  ;;  %v202_v3 = vadd.f32 %v818_v1, %v815_v0  ;;  %v826_v4 = vld [vmem:[%s812_s17 + $0x8] sm:$0xff]  ;;  %v832_v6 = vld [vmem:[%s812_s17 + $0x38] sm:$0xff]  ;;  %v234_v16 = vmax.f32 %v815_v0, %v818_v1  ;;  %741 = vmatpush3.bf16.xpose.msk.msra.mxu1 %vm906_vm3, %v739_v41 }
  0x12   : > { %v196_v7 = vadd.f32 %v826_v4, %v821_v2  ;;  %v837_v8 = vld [vmem:[%s812_s17 + $0x10] sm:$0xff]  ;;  %v840_v9 = vld [vmem:[%s812_s17 + $0x18] sm:$0xff]  ;;  %v205_v10 = vadd.f32 %v832_v6, %v829_v5  ;;  %v228_v13 = vmax.f32 %v821_v2, %v826_v4  ;;  %v851_v14 = vld [vmem:[%s812_s17 + $0x40] sm:$0xff]  ;;  %v237_v20 = vmax.f32 %v829_v5, %v832_v6  ;;  %742 = vmatprep.subr.bf16.mxu1 %v775_v36 }
  0x13   : > { %203 = vadd.xlane.f32.xlu1 %v202_v3  ;;  %v199_v11 = vadd.f32 %v840_v9, %v837_v8  ;;  %v231_v12 = vmax.f32 %v837_v8, %v840_v9  ;;  %v854_v15 = vld [vmem:[%s812_s17 + $0x48] sm:$0xff]  ;;  %v861_v18 = vld [vmem:[%s812_s17 + $0x50] sm:$0xff]  ;;  %v864_v19 = vld [vmem:[%s812_s17 + $0x58] sm:$0xff]  ;;  %v264_v3 = vsub.s32 %v261_v54, %v936_v58 }
  0x14   : > { %197 = vadd.xlane.f32.xlu0 %v196_v7  ;;  %v208_v17 = vadd.f32 %v854_v15, %v851_v14  ;;  %v211_v21 = vadd.f32 %v864_v19, %v861_v18  ;;  %v871_v22 = vld [vmem:[%s812_s17 + $0x60] sm:$0xff]  ;;  %v874_v23 = vld [vmem:[%s812_s17 + $0x68] sm:$0xff]  ;;  %v240_v24 = vmax.f32 %v851_v14, %v854_v15  ;;  %v881_v26 = vld [vmem:[%s812_s17 + $0x70] sm:$0xff]  ;;  %v243_v28 = vmax.f32 %v861_v18, %v864_v19 }
  0x15   : > { %v214_v25 = vadd.f32 %v874_v23, %v871_v22  ;;  %v884_v27 = vld [vmem:[%s812_s17 + $0x78] sm:$0xff]  ;;  %v246_v31 = vmax.f32 %v871_v22, %v874_v23 }
  0x16   : > { %v217_v29 = vadd.f32 %v884_v27, %v881_v26  ;;  %v249_v30 = vmax.f32 %v881_v26, %v884_v27 }
  0x17   : > { %206 = vadd.xlane.f32.xlu1 %v205_v10  ;;  %v280_v10 = vadd.s32 4294967272, %v261_v54 }
  0x18   : > { %200 = vadd.xlane.f32.xlu0 %v199_v11 }
  0x19   : > { %745 = vmatpush3.bf16.xpose.msk.msra.mxu1 %vm906_vm3, %v743_v44 }
  0x1a   : > { %746 = vmatprep.subr.bf16.mxu1 %v775_v36 }
  0x1b   : > { %232 = vmax.xlane.f32.xlu1 %v231_v12  ;;  %v287_v12 = vadd.s32 4294967264, %v261_v54 }
  0x1c   : > { %229 = vmax.xlane.f32.xlu0 %v228_v13  ;;  %v294_v13 = vadd.s32 4294967256, %v261_v54 }
  0x1d   : > { %v290_v32 = vsub.s32 %v287_v12, %v936_v58 }
  0x1e   : > { %v297_v34 = vsub.s32 %v294_v13, %v936_v58 }
  0x1f   : > { %235 = vmax.xlane.f32.xlu1 %v234_v16 }
  0x20   : > { %209 = vadd.xlane.f32.xlu0 %v208_v17  ;;  %v276_v17 = vsub.s32 %v273_v62, %v936_v58 }
  0x21   : > { %749 = vmatpush3.bf16.xpose.msk.msra.mxu1 %vm906_vm3, %v747_v47 }
  0x23   : > { %238 = vmax.xlane.f32.xlu1 %v237_v20 }
  0x24   : > { %212 = vadd.xlane.f32.xlu0 %v211_v21 }
  0x27   : > { %241 = vmax.xlane.f32.xlu1 %v240_v24  ;;  %v301_v24 = vadd.s32 4294967248, %v261_v54 }
  0x28   : > { %215 = vadd.xlane.f32.xlu0 %v214_v25 }
  0x29   : > { %v304_v41 = vsub.s32 %v301_v24, %v936_v58 }
  0x2b   : > { %244 = vmax.xlane.f32.xlu1 %v243_v28  ;;  %v283_v28 = vsub.s32 %v280_v10, %v936_v58 }
  0x2c   : > { %218 = vadd.xlane.f32.xlu0 %v217_v29 }
  0x2f   : > { %250 = vmax.xlane.f32.xlu1 %v249_v30 }
  0x30   : > { %247 = vmax.xlane.f32.xlu0 %v246_v31  ;;  %v308_v31 = vadd.s32 4294967240, %v261_v54 }
  0x32   : > { %v311_v46 = vsub.s32 %v308_v31, %v936_v58 }
  0xa0   : > { %v204_v48 = vpop.xlane.xlu1 %203 }
  0xa1   : > { %v198_v49 = vpop.xlane.xlu0 %197  ;;  %v222_v20 = vmul.f32 0.00390625, %v204_v48 }
  0xa2   : > { %v220_v7 = vmul.f32 0.00390625, %v198_v49 }
  0xa3   : > { %v277_v39 = vrot.slane %v222_v20, %v276_v17 }
  0xa4   : > { %v207_v50 = vpop.xlane.xlu1 %206  ;;  %v265_v25 = vrot.slane %v220_v7, %v264_v3 }
  0xa5   : > { %v201_v52 = vpop.xlane.xlu0 %200  ;;  %v223_v29 = vmul.f32 0.00390625, %v207_v50 }
  0xa6   : > { %v221_v61 = vmul.f32 0.00390625, %v201_v52 }
  0xa7   : > { %v284_v44 = vrot.slane %v223_v29, %v283_v28 }
  0xa8   : > { %v233_v53 = vpop.xlane.xlu1 %232  ;;  %v270_v16 = vrot.slane %v221_v61, %v269_v60 }
  0xa9   : > { %v230_v55 = vpop.xlane.xlu0 %229  ;;  %v331_v36 = vrot.slane %v233_v53, %v269_v60 }
  0xaa   : > { %v272_v35 = vsel %vm271_vm4, %v270_v16, %v265_v25  ;;  %v327_v37 = vrot.slane %v230_v55, %v264_v3 }
  0xab   : > { %v279_v48 = vsel %vm278_vm5, %v277_v39, %v272_v35 }
  0xac   : > { %v236_v57 = vpop.xlane.xlu1 %235  ;;  %v332_v52 = vsel %vm271_vm4, %v331_v36, %v327_v37  ;;  %v554_v36 = vsub.s32 0, %v936_v58 }
  0xad   : > { %v210_v59 = vpop.xlane.xlu0 %209  ;;  %v336_v40 = vrot.slane %v236_v57, %v276_v17 }
  0xae   : > { %v224_v33 = vmul.f32 0.00390625, %v210_v59  ;;  %v286_v59 = vsel %vm285_vm6, %v284_v44, %v279_v48 }
  0xaf   : > { %v337_v55 = vsel %vm278_vm5, %v336_v40, %v332_v52 }
  0xb0   : > { %v239_v63 = vpop.xlane.xlu1 %238  ;;  %v291_v49 = vrot.slane %v224_v33, %v290_v32 }
  0xb1   : > { %v213_v11 = vpop.xlane.xlu0 %212  ;;  %v341_v45 = vrot.slane %v239_v63, %v283_v28 }
  0xb2   : > { %v225_v38 = vmul.f32 0.00390625, %v213_v11  ;;  %v293_v3 = vsel %vm292_vm7, %v291_v49, %v286_v59 }
  0xb3   : > { %v342_v60 = vsel %vm285_vm6, %v341_v45, %v337_v55 }
  0xb4   : > { %v242_v21 = vpop.xlane.xlu1 %241  ;;  %v298_v53 = vrot.slane %v225_v38, %v297_v34 }
  0xb5   : > { %v216_v30 = vpop.xlane.xlu0 %215  ;;  %v346_v50 = vrot.slane %v242_v21, %v290_v32 }
  0xb6   : > { %v226_v42 = vmul.f32 0.00390625, %v216_v30  ;;  %v300_v11 = vsel %vm299_vm8, %v298_v53, %v293_v3 }
  0xb7   : > { %v347_v7 = vsel %vm292_vm7, %v346_v50, %v342_v60 }
  0xb8   : > { %v245_v43 = vpop.xlane.xlu1 %244  ;;  %v305_v56 = vrot.slane %v226_v42, %v304_v41 }
  0xb9   : > { %v219_v47 = vpop.xlane.xlu0 %218  ;;  %v351_v54 = vrot.slane %v245_v43, %v297_v34 }
  0xba   : > { %v227_v51 = vmul.f32 0.00390625, %v219_v47  ;;  %v307_v13 = vsel %vm306_vm9, %v305_v56, %v300_v11 }
  0xbb   : > { %v352_v12 = vsel %vm299_vm8, %v351_v54, %v347_v7 }
  0xbc   : > { %v251_v57 = vpop.xlane.xlu1 %250  ;;  %v312_v61 = vrot.slane %v227_v51, %v311_v46 }
  0xbd   : > { %v248_v62 = vpop.xlane.xlu0 %247  ;;  %v361_v63 = vrot.slane %v251_v57, %v311_v46 }
  0xbe   : > { %v356_v10 = vrot.slane %v248_v62, %v304_v41  ;;  %v314_v20 = vsel %vm313_vm10, %v312_v61, %v307_v13 }
  0xc0   : > { %v357_v16 = vsel %vm306_vm9, %v356_v10, %v352_v12 }
  0xc1   : > { %v362_v17 = vsel %vm313_vm10, %v361_v63, %v357_v16 }
  0xc2   : > { %v365_v21 = vsel %vm364_vm11, %v314_v20, %v362_v17 }
  0xc3   : > { %713 = vmatmul.mubr.msk.f32.vlgmr.msra.gmra.mrb[0].mxu0 %vm366_vm0, %v365_v21 }
 0x196   : > { %v439_v24 = vpop.f32.mrb[0].mxu0 }
 0x197   : > { %v443_v25 = vmax.f32 %v439_v24, 0.0  ;;  %v714_v28 = vpop.f32.mrb[1].mxu0 }
 0x199   : > { %732 = vmatmul.mubr.msk.f32.vlgmr.msra.gmra.mrb[0].mxu1 %vm444_vm2, %v443_v25 }
 0x26c   : > { %v538_v29 = vpop.f32.mrb[0].mxu1 }
 0x26d   : > { %v543_v30 = vrot.slane %v538_v29, 1  ;;  %v733_v31 = vpop.f32.mrb[1].mxu1 }
 0x26f   : > { %v545_v32 = vadd.f32 %v543_v30, %v538_v29 }
 0x271   : > { %v694_v33 = vmul.f32 -1.442695, %v545_v32 }
 0x273   : > { %761 = vpow2.f32 %v694_v33 }
 0x27d   : > { %v762_v34 = vpop.eup %761 }
 0x27e   : > { %v549_v35 = vadd.f32 1.0, %v762_v34 }
 0x280   : > { %763 = vrcp.f32 %v549_v35 }
 0x28a   : > { %v764_v37 = vpop.eup %763 }
 0x28b   : > { %v555_v38 = vrot.slane %v764_v37, %v554_v36 }
 0x28d   : > { %561 = vbcast.lane.b32.xlu1 %v555_v38, 264  ;;  %557 = vbcast.lane.b32.xlu0 %v555_v38, 256 }
 0x291   : > { %565 = vbcast.lane.b32.xlu1 %v555_v38, 272  ;;  %573 = vbcast.lane.b32.xlu0 %v555_v38, 288 }
 0x295   : > { %569 = vbcast.lane.b32.xlu1 %v555_v38, 280  ;;  %581 = vbcast.lane.b32.xlu0 %v555_v38, 304 }
 0x299   : > { %577 = vbcast.lane.b32.xlu1 %v555_v38, 296 }
 0x29d   : > { %585 = vbcast.lane.b32.xlu1 %v555_v38, 312 }
 0x2ff   : > { %v562_v58 = vpop.permute.xlu1 %561  ;;  %v558_v39 = vpop.permute.xlu0 %557 }
 0x300   : > { %v589_v40 = vmul.f32 %v562_v58, %v837_v8  ;;  %v590_v41 = vmul.f32 %v562_v58, %v840_v9  ;;  %v587_v42 = vmul.f32 %v558_v39, %v821_v2  ;;  %v588_v43 = vmul.f32 %v558_v39, %v826_v4 }
 0x302   : > { %605 = vst [vmem:[%s962_s11 + $0x10] sm:$0xff] %v589_v40  ;;  %606 = vst [vmem:[%s962_s11 + $0x18] sm:$0xff] %v590_v41 }
 0x303   : > { %603 = vst [vmem:[%s962_s11] sm:$0xff] %v587_v42  ;;  %604 = vst [vmem:[%s962_s11 + $0x8] sm:$0xff] %v588_v43  ;;  %v566_v44 = vpop.permute.xlu1 %565  ;;  %v574_v45 = vpop.permute.xlu0 %573 }
 0x304   : > { %v591_v46 = vmul.f32 %v566_v44, %v815_v0  ;;  %v592_v8 = vmul.f32 %v566_v44, %v818_v1  ;;  %v595_v9 = vmul.f32 %v574_v45, %v851_v14  ;;  %v596_v2 = vmul.f32 %v574_v45, %v854_v15 }
 0x306   : > { %607 = vst [vmem:[%s962_s11 + $0x20] sm:$0xff] %v591_v46  ;;  %608 = vst [vmem:[%s962_s11 + $0x28] sm:$0xff] %v592_v8 }
 0x307   : > { %611 = vst [vmem:[%s962_s11 + $0x40] sm:$0xff] %v595_v9  ;;  %612 = vst [vmem:[%s962_s11 + $0x48] sm:$0xff] %v596_v2  ;;  %v570_v4 = vpop.permute.xlu1 %569  ;;  %v582_v47 = vpop.permute.xlu0 %581 }
 0x308   : > { %v593_v48 = vmul.f32 %v570_v4, %v829_v5  ;;  %v594_v0 = vmul.f32 %v570_v4, %v832_v6  ;;  %v599_v1 = vmul.f32 %v582_v47, %v871_v22  ;;  %v600_v14 = vmul.f32 %v582_v47, %v874_v23 }
 0x30a   : > { %609 = vst [vmem:[%s962_s11 + $0x30] sm:$0xff] %v593_v48  ;;  %610 = vst [vmem:[%s962_s11 + $0x38] sm:$0xff] %v594_v0 }
 0x30b   : > { %615 = vst [vmem:[%s962_s11 + $0x60] sm:$0xff] %v599_v1  ;;  %616 = vst [vmem:[%s962_s11 + $0x68] sm:$0xff] %v600_v14  ;;  %v578_v15 = vpop.permute.xlu1 %577 }
 0x30c   : > { %v597_v49 = vmul.f32 %v578_v15, %v861_v18  ;;  %v598_v50 = vmul.f32 %v578_v15, %v864_v19 }
 0x30e   : > { %613 = vst [vmem:[%s962_s11 + $0x50] sm:$0xff] %v597_v49  ;;  %614 = vst [vmem:[%s962_s11 + $0x58] sm:$0xff] %v598_v50 }
 0x30f   : > { %v586_v5 = vpop.permute.xlu1 %585 }
 0x310   : > { %v601_v51 = vmul.f32 %v586_v5, %v881_v26  ;;  %v602_v6 = vmul.f32 %v586_v5, %v884_v27 }
 0x312   : > { %617 = vst [vmem:[%s962_s11 + $0x70] sm:$0xff] %v601_v51  ;;  %618 = vst [vmem:[%s962_s11 + $0x78] sm:$0xff] %v602_v6 }
 0x313 PF: > { %s13_s12 = sadd.s32 1, %s771_s12  }
 0x314   : > { %p10_p4 = scmp.ge.s32.totalorder %s13_s12, 4  }
 0x316   :  { %12 = sbr.rel (!%p10_p4) target bundleno = 1 (0x1), region = 62 }

</bundles_post_ra>
